<compile_context>
chip_gen: v7x
topology: tpu7x:2x2x1
jax: 0.10.0
libtpu: 0.0.40
codegen_flags: <defaults>
</compile_context>

<pallas_src>
import math
from functools import partial

import jax
import jax.numpy as jnp
from jax.experimental import pallas as pl
from jax.experimental.pallas import tpu as pltpu


# ---------------------------------------------------------------------------
# Parameter construction (deterministic, matches the PyTorch __init__ shapes)
# ---------------------------------------------------------------------------
def sinusoid_table(n_positions: int, d_model: int) -> jnp.ndarray:
    """Matches PositionalEncoding / FixedEmbedding table construction."""
    position = jnp.arange(n_positions, dtype=jnp.float32)[:, None]
    div_term = jnp.exp(
        jnp.arange(0, d_model, 2, dtype=jnp.float32) * -(math.log(10000.0) / d_model)
    )
    pe = jnp.zeros((n_positions, d_model), dtype=jnp.float32)
    pe = pe.at[:, 0::2].set(jnp.sin(position * div_term))
    pe = pe.at[:, 1::2].set(jnp.cos(position * div_term))
    return pe


def init_params(key, c_in: int, d_model: int, freq: str = "h"):
    # TokenEmbedding: Conv1d weight (d_model, c_in, 3), kaiming_normal_
    # (mode='fan_in', nonlinearity='leaky_relu', slope=0.01), no bias.
    fan_in = c_in * 3
    gain = math.sqrt(2.0 / (1.0 + 0.01 ** 2))
    std = gain / math.sqrt(fan_in)
    conv_w = std * jax.random.normal(key, (d_model, c_in, 3), dtype=jnp.float32)

    params = {
        "conv_w": conv_w,
        "pos_table": sinusoid_table(1000, d_model),   # PositionalEncoding (n_positions=1000)
        "hour_emb": sinusoid_table(24, d_model),      # TemporalEmbedding('fixed') tables
        "weekday_emb": sinusoid_table(7, d_model),
        "day_emb": sinusoid_table(32, d_model),
        "month_emb": sinusoid_table(13, d_model),
    }
    if freq == "t":
        params["minute_emb"] = sinusoid_table(4, d_model)
    return params


def temporal_embedding(x_timestamp, params):
    # Embedding lookups are gathers -> plain JAX glue (not in the kernel).
    x = x_timestamp.astype(jnp.int32)
    out = (
        jnp.take(params["hour_emb"], x[:, :, 3], axis=0)
        + jnp.take(params["weekday_emb"], x[:, :, 2], axis=0)
        + jnp.take(params["day_emb"], x[:, :, 1], axis=0)
        + jnp.take(params["month_emb"], x[:, :, 0], axis=0)
    )
    if "minute_emb" in params:
        out = out + jnp.take(params["minute_emb"], x[:, :, 4], axis=0)
    return out


# ---------------------------------------------------------------------------
# Pallas kernel
# ---------------------------------------------------------------------------
def _data_embedding_kernel(*refs, with_pos: bool, has_temporal: bool):
    it = iter(refs)
    x_ref = next(it)                    # (TL, c_in)   one seq-tile of one batch
    halo_ref = next(it)                 # (2, c_in)    circular neighbours of tile edges
    w_ref = next(it)                    # (3, c_in, d_model) conv taps, resident
    pos_ref = next(it) if with_pos else None        # (TL, d_model)
    temp_ref = next(it) if has_temporal else None   # (TL, d_model)
    o_ref = next(it)                    # (TL, d_model)

    x = x_ref[...]
    tl, c_in = x.shape
    halo = halo_ref[...]

    # Circular time shifts built in-kernel (XLU rotate, no extra HBM traffic).
    # x_prev[t] = x[t-1]; x_next[t] = x[t+1]; tile-edge rows come from the halo.
    row = jax.lax.broadcasted_iota(jnp.int32, (tl, c_in), 0)
    x_prev = jnp.where(row == 0, halo[0:1, :], pltpu.roll(x, 1, axis=0))
    x_next = jnp.where(row == tl - 1, halo[1:2, :], pltpu.roll(x, tl - 1, axis=0))

    # Conv1d(k=3) as three small matmuls against one resident weight ref,
    # accumulated in f32 on the MXU (kernel is HBM-bound; K=c_in is tiny).
    acc = jnp.dot(x_prev, w_ref[0], preferred_element_type=jnp.float32)
    acc += jnp.dot(x, w_ref[1], preferred_element_type=jnp.float32)
    acc += jnp.dot(x_next, w_ref[2], preferred_element_type=jnp.float32)

    if with_pos:
        acc += pos_ref[...]
    if has_temporal:
        acc += temp_ref[...]
    o_ref[...] = acc.astype(o_ref.dtype)


def _choose_seq_tile(L: int, max_tile: int = 256) -> int:
    """Largest tile <= max_tile that divides L and is a multiple of 8."""
    if L <= max_tile or L % 8 != 0:
        return L                      # full-extent block is always legal
    tl = max_tile - (max_tile % 8)
    while L % tl:
        tl -= 8
    return tl


def data_embedding(x, params, x_timestamp=None, with_pos=True, out_dtype=jnp.float32):
    """Pallas implementation of DataEmbedding.forward (dropout = identity)."""
    B, L, c_in = x.shape
    conv_w = params["conv_w"]                       # (d_model, c_in, 3)
    d_model = conv_w.shape[0]

    if with_pos and L > params["pos_table"].shape[0]:
        raise ValueError(
            f"sequence length {L} exceeds positional table size "
            f"{params['pos_table'].shape[0]}"
        )

    x = x.astype(jnp.float32)
    # Conv taps stacked tap-major: w[k] is the (c_in, d_model) matrix for tap k.
    w = jnp.transpose(conv_w, (2, 1, 0)).astype(jnp.float32)    # (3, c_in, d_model)

    TL = _choose_seq_tile(L)
    assert L % TL == 0
    n_tiles = L // TL

    # Per-tile circular halo rows: prev-of-first and next-of-last row of each
    # tile (tiny: (B, n_tiles, 2, c_in)).
    starts = jnp.arange(n_tiles) * TL
    prev_rows = jnp.take(x, (starts - 1) % L, axis=1)           # (B, n_tiles, c_in)
    next_rows = jnp.take(x, (starts + TL) % L, axis=1)          # (B, n_tiles, c_in)
    halo = jnp.stack([prev_rows, next_rows], axis=2)            # (B, n_tiles, 2, c_in)

    inputs = [x, halo, w]
    in_specs = [
        pl.BlockSpec((None, TL, c_in), lambda b, j: (b, j, 0)),
        pl.BlockSpec((None, None, 2, c_in), lambda b, j: (b, j, 0, 0)),
        # Constant index_map -> weights stay VMEM-resident, DMA'd once.
        pl.BlockSpec((3, c_in, d_model), lambda b, j: (0, 0, 0)),
    ]

    if with_pos:
        pos = params["pos_table"][:L].astype(jnp.float32)       # (L, d_model)
        inputs.append(pos)
        in_specs.append(pl.BlockSpec((TL, d_model), lambda b, j: (j, 0)))

    has_temporal = x_timestamp is not None
    if has_temporal:
        temp = temporal_embedding(x_timestamp, params)          # (B, L, d_model)
        inputs.append(temp)
        in_specs.append(pl.BlockSpec((None, TL, d_model), lambda b, j: (b, j, 0)))

    kernel = partial(_data_embedding_kernel,
                     with_pos=with_pos, has_temporal=has_temporal)

    out = pl.pallas_call(
        kernel,
        out_shape=jax.ShapeDtypeStruct((B, L, d_model), out_dtype),
        grid=(B, n_tiles),
        in_specs=in_specs,
        out_specs=pl.BlockSpec((None, TL, d_model), lambda b, j: (b, j, 0)),
        compiler_params=pltpu.CompilerParams(
            dimension_semantics=("parallel", "parallel"),
            vmem_limit_bytes=32 * 1024 * 1024,
        ),
    )(*inputs)

    # nn.Dropout(p=0.1) is identity at inference time.
    return out


# ---------------------------------------------------------------------------
# Pure-JAX reference (mirrors the PyTorch forward) for a correctness check
# ---------------------------------------------------------------------------
def data_embedding_ref(x, params, x_timestamp=None, with_pos=True):
    B, L, c_in = x.shape
    conv_w = params["conv_w"]
    x = x.astype(jnp.float32)
    x_prev = jnp.roll(x, 1, axis=1)
    x_next = jnp.roll(x, -1, axis=1)
    out = (
        jnp.einsum("blc,cd->bld", x_prev, conv_w[:, :, 0].T)
        + jnp.einsum("blc,cd->bld", x, conv_w[:, :, 1].T)
        + jnp.einsum("blc,cd->bld", x_next, conv_w[:, :, 2].T)
    )
    if x_timestamp is not None:
        out = out + temporal_embedding(x_timestamp, params)
    if with_pos:
        out = out + params["pos_table"][:L][None, :, :]
    return out


if __name__ == "__main__":
    B, L, C_IN, D_MODEL = 2, 8, 4, 128   # d_model multiple of 128 -> lane-dense stores

    key = jax.random.PRNGKey(0)
    k_param, k_x, k_mo, k_da, k_wd, k_hr = jax.random.split(key, 6)
    params = init_params(k_param, C_IN, D_MODEL, freq="h")
    x = jax.random.normal(k_x, (B, L, C_IN), dtype=jnp.float32)
    x_ts = jnp.stack(
        [
            jax.random.randint(k_mo, (B, L), 0, 13),   # month
            jax.random.randint(k_da, (B, L), 0, 32),   # day
            jax.random.randint(k_wd, (B, L), 0, 7),    # weekday
            jax.random.randint(k_hr, (B, L), 0, 24),   # hour
        ],
        axis=-1,
    )

    # Path 1: value embedding + positional encoding (no timestamps).
    out1 = jax.block_until_ready(data_embedding(x, params, x_timestamp=None))
    ref1 = data_embedding_ref(x, params, x_timestamp=None)
    assert out1.shape == (B, L, D_MODEL)
    assert jnp.max(jnp.abs(out1 - ref1)) < 1e-4, "mismatch vs reference (no timestamp)"

    # Path 2: value + temporal + positional embeddings.
    out2 = jax.block_until_ready(data_embedding(x, params, x_timestamp=x_ts))
    ref2 = data_embedding_ref(x, params, x_timestamp=x_ts)
    assert jnp.max(jnp.abs(out2 - ref2)) < 1e-4, "mismatch vs reference (with timestamp)"

    print("KERNEL_OK")
</pallas_src>

<mosaic_0001>
module attributes {stable_mosaic.version = 11 : i64} {
  func.func @_data_embedding_kernel(%arg0: i32, %arg1: i32, %arg2: memref<1x8x4xf32, #tpu.memory_space<vmem>>, %arg3: memref<1x1x2x4xf32, #tpu.memory_space<vmem>>, %arg4: memref<3x4x128xf32, #tpu.memory_space<vmem>>, %arg5: memref<8x128xf32, #tpu.memory_space<vmem>>, %arg6: memref<1x8x128xf32, #tpu.memory_space<vmem>>) attributes {dimension_semantics = [#tpu.dimension_semantics<parallel>, #tpu.dimension_semantics<parallel>], iteration_bounds = array<i64: 2, 1>, scalar_prefetch = 0 : i64, scratch_operands = 0 : i64, tpu.core_type = #tpu.core_type<tc>, window_params = [{transform_indices = @transform_0, window_bounds = array<i64: 1, 8, 4>}, {transform_indices = @transform_1, window_bounds = array<i64: 1, 1, 2, 4>}, {pipeline_mode = #tpu.pipeline_mode<synchronous>, transform_indices = @transform_2, window_bounds = array<i64: 3, 4, 128>}, {transform_indices = @transform_3, window_bounds = array<i64: 8, 128>}, {transform_indices = @transform_4, window_bounds = array<i64: 1, 8, 128>}]} {
    %c0 = arith.constant 0 : index
    %c0_0 = arith.constant 0 : index
    %c0_1 = arith.constant 0 : index
    %0 = vector.load %arg2[%c0, %c0_0, %c0_1] : memref<1x8x4xf32, #tpu.memory_space<vmem>>, vector<1x8x4xf32>
    %1 = vector.shape_cast %0 : vector<1x8x4xf32> to vector<8x4xf32>
    %c0_2 = arith.constant 0 : index
    %c0_3 = arith.constant 0 : index
    %c0_4 = arith.constant 0 : index
    %c0_5 = arith.constant 0 : index
    %2 = vector.load %arg3[%c0_2, %c0_3, %c0_4, %c0_5] : memref<1x1x2x4xf32, #tpu.memory_space<vmem>>, vector<1x1x2x4xf32>
    %3 = vector.shape_cast %2 : vector<1x1x2x4xf32> to vector<2x4xf32>
    %4 = tpu.iota {dimensions = array<i32: 0>} : vector<8x4xi32>
    %c0_i32 = arith.constant 0 : i32
    %5 = vector.broadcast %c0_i32 : i32 to vector<8x4xi32>
    %6 = arith.cmpi eq, %4, %5 : vector<8x4xi32>
    %7 = vector.extract_strided_slice %3 {offsets = [0, 0], sizes = [1, 4], strides = [1, 1]} : vector<2x4xf32> to vector<1x4xf32>
    %c1_i32 = arith.constant 1 : i32
    %8 = tpu.dynamic_rotate %1 by %c1_i32 dim 0 : vector<8x4xf32>, i32 -> vector<8x4xf32>
    %9 = vector.shape_cast %7 : vector<1x4xf32> to vector<1x4xf32>
    %10 = vector.broadcast %9 : vector<1x4xf32> to vector<8x4xf32>
    %11 = arith.select %6, %10, %8 : vector<8x4xi1>, vector<8x4xf32>
    %c7_i32 = arith.constant 7 : i32
    %12 = vector.broadcast %c7_i32 : i32 to vector<8x4xi32>
    %13 = arith.cmpi eq, %4, %12 : vector<8x4xi32>
    %14 = vector.extract_strided_slice %3 {offsets = [1, 0], sizes = [1, 4], strides = [1, 1]} : vector<2x4xf32> to vector<1x4xf32>
    %c7_i32_6 = arith.constant 7 : i32
    %15 = tpu.dynamic_rotate %1 by %c7_i32_6 dim 0 : vector<8x4xf32>, i32 -> vector<8x4xf32>
    %16 = vector.shape_cast %14 : vector<1x4xf32> to vector<1x4xf32>
    %17 = vector.broadcast %16 : vector<1x4xf32> to vector<8x4xf32>
    %18 = arith.select %13, %17, %15 : vector<8x4xi1>, vector<8x4xf32>
    %c0_7 = arith.constant 0 : index
    %c0_8 = arith.constant 0 : index
    %c0_9 = arith.constant 0 : index
    %19 = vector.load %arg4[%c0_7, %c0_8, %c0_9] : memref<3x4x128xf32, #tpu.memory_space<vmem>>, vector<1x4x128xf32>
    %20 = vector.shape_cast %19 : vector<1x4x128xf32> to vector<4x128xf32>
    %cst = arith.constant dense<0.000000e+00> : vector<8x128xf32>
    %21 = tpu.matmul %11, %20, %cst {dimension_numbers = #tpu.dot_dimension_numbers<[1], [0], [0], [1], [0, 0, 1, 1], [], []>} : vector<8x4xf32>, vector<4x128xf32>, vector<8x128xf32> -> vector<8x128xf32>
    %c1 = arith.constant 1 : index
    %c0_10 = arith.constant 0 : index
    %c0_11 = arith.constant 0 : index
    %22 = vector.load %arg4[%c1, %c0_10, %c0_11] : memref<3x4x128xf32, #tpu.memory_space<vmem>>, vector<1x4x128xf32>
    %23 = vector.shape_cast %22 : vector<1x4x128xf32> to vector<4x128xf32>
    %cst_12 = arith.constant dense<0.000000e+00> : vector<8x128xf32>
    %24 = tpu.matmul %1, %23, %cst_12 {dimension_numbers = #tpu.dot_dimension_numbers<[1], [0], [0], [1], [0, 0, 1, 1], [], []>} : vector<8x4xf32>, vector<4x128xf32>, vector<8x128xf32> -> vector<8x128xf32>
    %25 = arith.addf %21, %24 : vector<8x128xf32>
    %c2 = arith.constant 2 : index
    %c0_13 = arith.constant 0 : index
    %c0_14 = arith.constant 0 : index
    %26 = vector.load %arg4[%c2, %c0_13, %c0_14] : memref<3x4x128xf32, #tpu.memory_space<vmem>>, vector<1x4x128xf32>
    %27 = vector.shape_cast %26 : vector<1x4x128xf32> to vector<4x128xf32>
    %cst_15 = arith.constant dense<0.000000e+00> : vector<8x128xf32>
    %28 = tpu.matmul %18, %27, %cst_15 {dimension_numbers = #tpu.dot_dimension_numbers<[1], [0], [0], [1], [0, 0, 1, 1], [], []>} : vector<8x4xf32>, vector<4x128xf32>, vector<8x128xf32> -> vector<8x128xf32>
    %29 = arith.addf %25, %28 : vector<8x128xf32>
    %c0_16 = arith.constant 0 : index
    %c0_17 = arith.constant 0 : index
    %30 = vector.load %arg5[%c0_16, %c0_17] : memref<8x128xf32, #tpu.memory_space<vmem>>, vector<8x128xf32>
    %31 = arith.addf %29, %30 : vector<8x128xf32>
    %c0_18 = arith.constant 0 : index
    %c0_19 = arith.constant 0 : index
    %c0_20 = arith.constant 0 : index
    %32 = vector.load %arg6[%c0_18, %c0_19, %c0_20] : memref<1x8x128xf32, #tpu.memory_space<vmem>>, vector<1x8x128xf32>
    %33 = vector.shape_cast %32 : vector<1x8x128xf32> to vector<8x128xf32>
    %34 = vector.shape_cast %31 : vector<8x128xf32> to vector<1x8x128xf32>
    tpu.vector_store %arg6[%c0_18, %c0_19, %c0_20], %34 {strides = array<i32>} : memref<1x8x128xf32, #tpu.memory_space<vmem>>, vector<1x8x128xf32>,
    return
  }
  func.func @transform_0(%arg0: i32, %arg1: i32) -> (i32, i32, i32) {
    %c0_i32 = arith.constant 0 : i32
    %c0_i32_0 = arith.constant 0 : i32
    return %arg0, %arg1, %c0_i32 : i32, i32, i32
  }
  func.func @transform_1(%arg0: i32, %arg1: i32) -> (i32, i32, i32, i32) {
    %c0_i32 = arith.constant 0 : i32
    %c0_i32_0 = arith.constant 0 : i32
    %c0_i32_1 = arith.constant 0 : i32
    return %arg0, %arg1, %c0_i32, %c0_i32_0 : i32, i32, i32, i32
  }
  func.func @transform_2(%arg0: i32, %arg1: i32) -> (i32, i32, i32) {
    %c0_i32 = arith.constant 0 : i32
    %c0_i32_0 = arith.constant 0 : i32
    %c0_i32_1 = arith.constant 0 : i32
    %c0_i32_2 = arith.constant 0 : i32
    return %c0_i32, %c0_i32_0, %c0_i32_1 : i32, i32, i32
  }
  func.func @transform_3(%arg0: i32, %arg1: i32) -> (i32, i32) {
    %c0_i32 = arith.constant 0 : i32
    %c0_i32_0 = arith.constant 0 : i32
    return %arg1, %c0_i32 : i32, i32
  }
  func.func @transform_4(%arg0: i32, %arg1: i32) -> (i32, i32, i32) {
    %c0_i32 = arith.constant 0 : i32
    %c0_i32_0 = arith.constant 0 : i32
    return %arg0, %arg1, %c0_i32 : i32, i32, i32
  }
}

</mosaic_0001>

<bundles_post_ra>
// kernel: tpu_custom_call.1
= control target key start
LH: loop header
LB: loop body
LE: loop exit
PB: predicated region body
PF: predicated region fallthrough
CT: control target
= control target key end

     0   :  { %9 = vsyncpa [#allocation3], 0  ;;  %s979_s0 = inlined_call_operand.vmem [shape: f32[2,8,4], index: 0, kind: input, shape index: {}]   ;;  %s980_s1 = inlined_call_operand.vmem [shape: f32[2,1,2,4], index: 1, kind: input, shape index: {}]   ;;  %s981_s2 = inlined_call_operand.vmem [shape: f32[3,4,128], index: 2, kind: input, shape index: {}]   ;;  %s982_s3 = inlined_call_operand.vmem [shape: f32[8,128], index: 3, kind: input, shape index: {}]   ;;  %s983_s4 = inlined_call_operand.hbm [shape: f32[2,8,128], index: 4, kind: output, shape index: {}]  }
   0x1   :  { %11 = vsyncpa [#allocation3 + $0x1], 0  ;;  %s843_s15 = smov 0   ;;  %s845_s16 = smov 0  }
   0x2   :  { %s847_s17 = smov 0   ;;  %s849_s18 = smov 0  }
   0x3   :  { %s851_s19 = smov 0   ;;  %s853_s20 = smov 0  }
   0x4 LB: > { %s636_s21 = sadd.s32 4294967295, %s813_s20   ;;  %s637_s22 = sadd.s32 4294967294, %s813_s20   ;;  %s813_s20 = sphi %s853_s20, %s17_s20   ;;  %s809_s19 = sphi %s851_s19, %s990_s19   ;;  %s805_s18 = sphi %s849_s18, %s989_s18   ;;  %s801_s17 = sphi %s847_s17, %s988_s17   ;;  %s797_s16 = sphi %s845_s16, %s987_s16   ;;  %s793_s15 = sphi %s843_s15, %s986_s15  }
   0x5   : > { %s29_s23 = sadd.s32 1, %s809_s19  ;;  %s141_s24 = sadd.s32 1, %s801_s17 }
   0x6   : > { %p31_p0 = scmp.ge.s32.totalorder %s29_s23, 2  ;;  %p151_p1 = scmp.ne.s32.totalorder %s801_s17, %s797_s16 }
   0x7   : > { %p152_p2 = scmp.eq.s32.totalorder %s636_s21, 1  ;;  %p157_p3 = scmp.ne.s32.totalorder %s797_s16, %s793_s15 }
   0x8   : > { %s992_s23 = smov (%p31_p0, %s29_s23), 0  ;;  %p158_p5 = scmp.eq.s32.totalorder %s637_s22, 1 }
   0x9   : > { %p883_p4 = por %p152_p2, %p151_p1  ;;  %s136_s26 = ssub.s32 %s809_s19, %s992_s23 }
   0xa   : > { %p641_p6 = scmp.ge.s32.totalorder %s813_s20, 1  ;;  %p139_p7 = scmp.eq.s32.totalorder %s136_s26, 0 }
   0xb   : > { %p890_p8 = por %p158_p5, %p157_p3  ;;  %p206_p9 = scmp.lt.s32.totalorder %s813_s20, 3 }
   0xc   : > { %s896_s28 = scalar_select %p139_p7, %s801_s17, %s141_s24  }
   0xd   : > { %p207_p10 = pnand %p641_p6, %p206_p9 }
   0xe   : > { %v645_v0 = vld [vmem:[%s981_s2 + $0x4] sm:$0xf] (!%p207_p10)  ;;  %vm288_vm0 = vcmask (!%p207_p10), 1043456   ;;  %p245_p11 = scmp.lt.s32.totalorder (!%p207_p10), %s805_s18, 1  ;;  %v265_v1 = vlaneseq (!%p207_p10)  ;;  %v815_v2 = vmov (!%p207_p10), 0.0   ;;  %vm816_vm1 = vmmov (!%p207_p10), 0  }
   0xf   : > { %210 = sbr.rel (%p207_p10) target bundleno = 263 (0x107), region = 36  ;;  %663 = vmatprep.subr.mxu0 (!%p207_p10), %v815_v2  ;;  %665 = vmatprep.mubr.msk.f32.mxu0 (!%p207_p10), %vm816_vm1, %v815_v2  ;;  %v281_v3 = vld [vmem:[%s981_s2] sm:$0xf] (!%p207_p10)  ;;  %vm284_vm2 = vcmask (!%p207_p10), 31744   ;;  %v650_v7 = vld [vmem:[%s981_s2 + $0x8] sm:$0xf] (!%p207_p10) }
  0x10   : > { %664 = vmatpush3.msk.msra.mxu0 (!%p207_p10), %vm288_vm0, %v645_v0  ;;  %v266_v4 = vshrl.u32 (!%p207_p10), %v265_v1, 7  ;;  %668 = vmatprep.subr.mxu1 (!%p207_p10), %v815_v2  ;;  %s242_s26 = sand.u32 (!%p207_p10), 1, %s797_s16   ;;  %v517_v22 = vld [vmem:[%s982_s3] sm:$0xff] (!%p207_p10)  ;;  %s654_s6 = sshll.u32 (!%p207_p10), %s805_s18, 7 }
  0x11   : > { %673 = vmatprep.subr.mxu0 (!%p207_p10), %v815_v2  ;;  %669 = vmatpush3.msk.msra.mxu1 (!%p207_p10), %vm288_vm0, %v281_v3  ;;  %s642_s29 = sshll.u32 (!%p207_p10), %s242_s26, 3  ;;  %s932_s11 = scalar_lea.hbm (!%p207_p10), %s983_s4, %s654_s6 }
  0x12   : > { %v278_v5 = vsub.s32 (!%p207_p10), 1, %v266_v4  ;;  %670 = vmatprep.mubr.msk.f32.mxu1 (!%p207_p10), %vm816_vm1, %v815_v2  ;;  %v271_v6 = vsub.s32 (!%p207_p10), 0, %v266_v4  ;;  %vm267_vm3 = vcmp.eq.s32.totalorder (!%p207_p10), %v266_v4, 0  ;;  %vm274_vm4 = vcmp.eq.s32.totalorder (!%p207_p10), %v266_v4, 7 }
  0x16   : > { %s246_s7 = scalar_select %p245_p11, %s805_s18, 1 }
  0x17   : > { %s817_s18 = smov [#allocation2]  }
  0x18   : > { %s643_s8 = sshll.u32 %s246_s7, 3  ;;  %s644_s9 = sshll.u32 %s246_s7, 1 }
  0x19   : > { %s251_s12 = scalar_lea.vmem %s979_s0, %s643_s8  ;;  %s258_s21 = scalar_lea.vmem %s980_s1, %s644_s9 }
  0x1a   : > { %v263_v8 = vld [vmem:[%s251_s12] sm:$0xff]  ;;  %s244_s7 = scalar_lea.vmem [#allocation2], %s642_s29  ;;  %s521_s12 = scalar_lea.sflag [#allocation3], %s242_s26 }
  0x1b   : > { %v264_v9 = vld [vmem:[%s258_s21] sm:$0x3]  ;;  %v268_v10 = vrot.slane %v263_v8, 7  ;;  %v275_v11 = vrot.slane %v263_v8, 1  ;;  %666 = vmatmul.mubr.msk.f32.vlgmr.msra.gmra.mrb[0].mxu0 %vm284_vm2, %v263_v8  ;;  %s535_s8 = sshll.u32 %s244_s7, 4  ;;  %s739_s14 = sshll.u32 %s817_s18, 4  ;;  %s934_s8 = int_to_ptr.vmem [resolvable:$true] %s535_s8  ;;  %s740_s14 = int_to_ptr.vmem [resolvable:$false] %s739_s14 }
  0x1c   : > { %v279_v12 = vrot.slane %v264_v9, %v278_v5  ;;  %v272_v13 = vrot.slane %v264_v9, %v271_v6  ;;  %674 = vmatpush3.msk.msra.mxu0 %vm288_vm0, %v650_v7  ;;  %675 = vmatprep.mubr.msk.f32.mxu0 %vm816_vm1, %v815_v2  ;;  %s735_s13 = scalar_lea.vmem %s934_s8, 128  ;;  %s741_s21 = scalar_lea.vmem %s740_s14, 256 }
  0x1d   : > { %p736_p12 = scmp.ne.s32.totalorder %s934_s8, %s735_s13  ;;  %p742_p1 = scmp.lt.s32.totalorder %s934_s8, %s740_s14 }
  0x1e   : > { %v273_v14 = vsel %vm267_vm3, %v272_v13, %v268_v10  ;;  %v280_v15 = vsel %vm274_vm4, %v279_v12, %v275_v11  ;;  %p743_p2 = scmp.lt.s32.totalorder %s741_s21, %s735_s13 }
  0x1f   : > { %671 = vmatmul.mubr.msk.f32.vlgmr.msra.gmra.mrb[0].mxu1 %vm284_vm2, %v273_v14  ;;  %676 = vmatmul.mubr.msk.f32.vlgmr.msra.gmra.mrb[2].mxu0 %vm284_vm2, %v280_v15  ;;  %p737_p13 = pnand %p736_p12, %p883_p4 }
  0x20   : > { %p744_p3 = por %p743_p2, %p742_p1 }
  0x21   : > { %p738_p0 = pneg %p737_p13 }
  0x23   : > { %p745_p5 = pnand %p744_p3, %p738_p0 }
  0xee   : > { %v358_v16 = vpop.f32.mrb[0].mxu0 }
  0xef   : > { %v667_v17 = vpop.f32.mrb[1].mxu0 }
  0xf2   : > { %v434_v18 = vpop.f32.mrb[0].mxu1  ;;  %v512_v21 = vpop.f32.mrb[2].mxu0 }
  0xf3   : > { %v435_v19 = vadd.f32 %v434_v18, %v358_v16  ;;  %v672_v20 = vpop.f32.mrb[1].mxu1  ;;  %v677_v23 = vpop.f32.mrb[3].mxu0 }
  0xf5   : > { %v516_v24 = vadd.f32 %v512_v21, %v435_v19 }
  0xf7   : > { %v518_v25 = vadd.f32 %v517_v22, %v516_v24 }
  0xf9   : > { %519 = vst [vmem:[%s244_s7] sm:$0xff] %v518_v25 }
  0xfa   : > { %748 = shalt.err (!%p745_p5)
}
  0xfb   : > { %s749_s22 = scalar_lea.hbm %s932_s11, 128  ;;  %s753_s29 = scalar_lea.hbm %s983_s4, 256 }
  0xfc   : > { %p750_p6 = scmp.ne.s32.totalorder %s932_s11, %s749_s22  ;;  %p754_p10 = scmp.lt.u32.totalorder %s932_s11, %s983_s4 }
  0xfd   : > { %p755_p11 = scmp.lt.u32.totalorder %s753_s29, %s749_s22  ;;  %p757_p13 = scmp.lt.u32.totalorder %s749_s22, %s932_s11 }
  0xfe   : > { %p751_p7 = pnand %p750_p6, %p883_p4 }
  0xff   : > { %p756_p12 = por %p755_p11, %p754_p10 }
 0x100   : > { %p752_p9 = pneg %p751_p7 }
 0x101   : > { %p758_p0 = por %p757_p13, %p756_p12 }
 0x103   : > { %p759_p1 = pnand %p758_p0, %p752_p9 }
 0x105   : > { %762 = shalt.err (!%p759_p1)
}
 0x106   : > { %678 = dma.vmem_to_hbm [thread:$0]  (%p883_p4), %s934_s8, 128, %s932_s11, %s521_s12  }
 0x107 PF: > { %p684_p2 = scmp.ge.s32.totalorder %s813_s20, 2  ;;  %s547_s6 = sand.u32 1, %s793_s15  }
 0x108   : > { %s548_s7 = scalar_lea.sflag [#allocation3], %s547_s6 }
 0x109   : > { %p681_p3 = pnand %p684_p2, %p890_p8 }
 0x10b   : > { %788 = dma.done.wait (!%p681_p3), %s548_s7, 128  }
 0x10c   : > { %790 = vsyncadd (!%p681_p3), %s548_s7, 4294967168  ;;  %s17_s20 = sadd.s32 1, %s813_s20   ;;  %s986_s15 = smov %s797_s16 }
 0x10d   : > { %p14_p5 = scmp.ge.s32.totalorder %s17_s20, 4   ;;  %s987_s16 = smov %s801_s17 }
 0x10e   : > { %s988_s17 = smov %s896_s28  ;;  %s989_s18 = smov %s809_s19 }
 0x10f   : > { %s990_s19 = smov %s992_s23  ;;  %16 = sbr.rel (!%p14_p5) target bundleno = 4 (0x4), region = 79 }
 0x116   :  { %553 = vsyncpa [#allocation3], 1 }
 0x117   :  { %555 = vsyncpa [#allocation3 + $0x1], 1 }

</bundles_post_ra>
